<compile_context>
chip_gen: v5e
topology: v5e:2x2
jax: 0.10.0
libtpu: 0.0.40
codegen_flags: <defaults>
</compile_context>

<pallas_src>
import math

import jax
import jax.numpy as jnp
from jax.experimental import pallas as pl
from jax.experimental.pallas import tpu as pltpu


def _pos_enc_kernel(x_ref, pe_ref, o_ref):
    # x_ref / o_ref: (ts, B, D);  pe_ref: (ts, 1, D).
    # One whole-tile add; the batch broadcast is a sublane broadcast on the VPU,
    # so there are no per-batch slices and no masked partial stores.
    o_ref[...] = x_ref[...] + pe_ref[...]


def make_pe(d_model: int, max_len: int = 5000) -> jnp.ndarray:
    """Deterministic buffer construction, mirrors the PyTorch __init__ exactly.

    Note: the reference module assumes an even d_model (odd d_model would fail
    the `pe[:, 0, 1::2]` assignment in PyTorch)."""
    position = jnp.arange(max_len, dtype=jnp.float32)[:, None]          # (max_len, 1)
    div_term = jnp.exp(
        jnp.arange(0, d_model, 2, dtype=jnp.float32)
        * (-math.log(10000.0) / d_model)
    )                                                                   # (ceil(D/2),)
    angles = position * div_term                                        # (max_len, D/2)
    pe = jnp.zeros((max_len, 1, d_model), dtype=jnp.float32)
    pe = pe.at[:, 0, 0::2].set(jnp.sin(angles))
    pe = pe.at[:, 0, 1::2].set(jnp.cos(angles)[:, : d_model // 2])
    return pe


def positional_encoding(
    x: jnp.ndarray,
    pe: jnp.ndarray,
    *,
    tile_rows: int | None = None,
    donate_x: bool = False,
) -> jnp.ndarray:
    """x: (S, B, D); pe: (max_len, 1, D) float32 buffer. Returns x + pe[:S]."""
    S, B, D = x.shape
    max_len = pe.shape[0]
    assert pe.shape == (max_len, 1, D), "pe buffer shape mismatch"
    assert max_len >= S, "pe buffer shorter than sequence"

    dtype = x.dtype
    pe = pe.astype(dtype)  # dtype-aware: no mixed-dtype store, half the pe bytes for bf16

    # --- dtype-aware VMEM budgeting (minor (B, D) tile pads to (sublane, 128)) ---
    itemsize = jnp.dtype(dtype).itemsize
    sublane = {4: 8, 2: 16, 1: 32}.get(itemsize, 8)
    b_pad = -(-B // sublane) * sublane
    d_pad = -(-D // 128) * 128
    x_row_bytes = b_pad * d_pad * itemsize          # VMEM bytes of one seq row of x / out
    pe_row_bytes = sublane * d_pad * itemsize       # (ts, 1, D) pads its sublane dim too
    per_row_bytes = 2 * x_row_bytes + pe_row_bytes  # x + out + pe, single-buffered

    if tile_rows is None:
        # ~12 MiB single-buffered working set (~24 MiB double-buffered < 48 MiB limit).
        target_bytes = 12 * 1024 * 1024
        ts = max(1, target_bytes // max(1, per_row_bytes))
        # >= 4 pipeline steps when possible: hides both DMA directions and gives
        # each v7x TensorCore >= 2 tiles of the parallel sequence axis.
        ts = min(ts, max(1, pl.cdiv(S, 4)))
    else:
        ts = tile_rows
    ts = max(1, min(ts, S))     # leading block dim has no (8,128) constraint for 3-D blocks
    grid = (pl.cdiv(S, ts),)

    out = pl.pallas_call(
        _pos_enc_kernel,
        out_shape=jax.ShapeDtypeStruct((S, B, D), dtype),
        grid_spec=pltpu.PrefetchScalarGridSpec(
            num_scalar_prefetch=0,
            grid=grid,
            in_specs=[
                pl.BlockSpec((ts, B, D), lambda i: (i, 0, 0)),   # x tile
                pl.BlockSpec((ts, 1, D), lambda i: (i, 0, 0)),   # pe[:S] slice folded in
            ],
            out_specs=pl.BlockSpec((ts, B, D), lambda i: (i, 0, 0)),
            # If profiling shows exposed DMA, sweep pipeline_mode=pl.Buffered(3)
            # on the x / out specs (costs one extra tile of VMEM).
        ),
        compiler_params=pltpu.CompilerParams(
            dimension_semantics=("parallel",),        # shard seq tiles across v7x's 2 TCs
            vmem_limit_bytes=48 * 1024 * 1024,        # v5e default is 16 MiB; safe on v7x
        ),
        input_output_aliases=({0: 0} if donate_x else {}),
    )(x, pe)
    return out


if __name__ == "__main__":
    key = jax.random.PRNGKey(0)
    k1, k2, k3 = jax.random.split(key, 3)

    # Shapes implied by the module: (seq_len, batch, d_model), seq-first.
    batch, d_model, max_len = 2, 32, 64          # module default max_len=5000; small for test
    pe = make_pe(d_model, max_len=max_len)

    # Check 1: auto tile selection (grid > 1, pipelined path).
    seq_len = 8
    x1 = jax.random.normal(k1, (seq_len, batch, d_model), dtype=jnp.float32)
    out1 = positional_encoding(x1, pe)
    jax.block_until_ready(out1)
    ref1 = x1 + pe[:seq_len]
    assert out1.shape == (seq_len, batch, d_model)
    assert jnp.allclose(out1, ref1, atol=1e-6), "mismatch vs reference (auto tiles)"

    # Check 2: explicit tiling with a partial final block (20 rows, 8-row tiles).
    seq_len2 = 20
    x2 = jax.random.normal(k2, (seq_len2, batch, d_model), dtype=jnp.float32)
    out2 = positional_encoding(x2, pe, tile_rows=8)
    jax.block_until_ready(out2)
    ref2 = x2 + pe[:seq_len2]
    assert jnp.allclose(out2, ref2, atol=1e-6), "mismatch vs reference (partial tile)"

    # Check 3: bf16 activations (pe cast to x.dtype inside the wrapper).
    seq_len3 = 16
    x3 = jax.random.normal(k3, (seq_len3, batch, d_model), dtype=jnp.float32).astype(jnp.bfloat16)
    out3 = positional_encoding(x3, pe)
    jax.block_until_ready(out3)
    ref3 = x3 + pe[:seq_len3].astype(jnp.bfloat16)
    assert out3.dtype == jnp.bfloat16
    assert jnp.allclose(out3.astype(jnp.float32), ref3.astype(jnp.float32),
                        atol=5e-2, rtol=2e-2), "mismatch vs reference (bf16)"

    print("KERNEL_OK")
</pallas_src>

<mosaic_0001>
module attributes {stable_mosaic.version = 11 : i64} {
  func.func @_pos_enc_kernel(%arg0: i32, %arg1: memref<2x2x32xf32, #tpu.memory_space<vmem>>, %arg2: memref<2x1x32xf32, #tpu.memory_space<vmem>>, %arg3: memref<2x2x32xf32, #tpu.memory_space<vmem>>) attributes {dimension_semantics = [#tpu.dimension_semantics<parallel>], iteration_bounds = array<i64: 4>, scalar_prefetch = 0 : i64, scratch_operands = 0 : i64, tpu.core_type = #tpu.core_type<tc>, window_params = [{transform_indices = @transform_0, window_bounds = array<i64: 2, 2, 32>}, {transform_indices = @transform_1, window_bounds = array<i64: 2, 1, 32>}, {transform_indices = @transform_2, window_bounds = array<i64: 2, 2, 32>}]} {
    %c0 = arith.constant 0 : index
    %c0_0 = arith.constant 0 : index
    %c0_1 = arith.constant 0 : index
    %0 = vector.load %arg1[%c0, %c0_0, %c0_1] : memref<2x2x32xf32, #tpu.memory_space<vmem>>, vector<2x2x32xf32>
    %c0_2 = arith.constant 0 : index
    %c0_3 = arith.constant 0 : index
    %c0_4 = arith.constant 0 : index
    %1 = vector.load %arg2[%c0_2, %c0_3, %c0_4] : memref<2x1x32xf32, #tpu.memory_space<vmem>>, vector<2x1x32xf32>
    %2 = vector.broadcast %1 : vector<2x1x32xf32> to vector<2x2x32xf32>
    %3 = arith.addf %0, %2 : vector<2x2x32xf32>
    %c0_5 = arith.constant 0 : index
    %c0_6 = arith.constant 0 : index
    %c0_7 = arith.constant 0 : index
    %4 = vector.load %arg3[%c0_5, %c0_6, %c0_7] : memref<2x2x32xf32, #tpu.memory_space<vmem>>, vector<2x2x32xf32>
    tpu.vector_store %arg3[%c0_5, %c0_6, %c0_7], %3 {strides = array<i32>} : memref<2x2x32xf32, #tpu.memory_space<vmem>>, vector<2x2x32xf32>,
    return
  }
  func.func @transform_0(%arg0: i32) -> (i32, i32, i32) {
    %c0_i32 = arith.constant 0 : i32
    %c0_i32_0 = arith.constant 0 : i32
    %c0_i32_1 = arith.constant 0 : i32
    return %arg0, %c0_i32, %c0_i32_0 : i32, i32, i32
  }
  func.func @transform_1(%arg0: i32) -> (i32, i32, i32) {
    %c0_i32 = arith.constant 0 : i32
    %c0_i32_0 = arith.constant 0 : i32
    %c0_i32_1 = arith.constant 0 : i32
    return %arg0, %c0_i32, %c0_i32_0 : i32, i32, i32
  }
  func.func @transform_2(%arg0: i32) -> (i32, i32, i32) {
    %c0_i32 = arith.constant 0 : i32
    %c0_i32_0 = arith.constant 0 : i32
    %c0_i32_1 = arith.constant 0 : i32
    return %arg0, %c0_i32, %c0_i32_0 : i32, i32, i32
  }
}

</mosaic_0001>

<bundles_post_ra>
// kernel: tpu_custom_call.1
= control target key start
LH: loop header
LB: loop body
LE: loop exit
PB: predicated region body
PF: predicated region fallthrough
CT: control target
= control target key end

     0   :  { %7 = vsyncpa [#allocation3], 0  ;;  %s491_s0 = inlined_call_operand.vmem [shape: f32[8,2,32], index: 0, kind: input, shape index: {}]   ;;  %s492_s1 = inlined_call_operand.vmem [shape: f32[64,1,32], index: 1, kind: input, shape index: {}]   ;;  %s493_s2 = inlined_call_operand.hbm [shape: f32[8,2,32], index: 2, kind: output, shape index: {}]  }
   0x1   :  { %9 = vsyncpa [#allocation3 + $0x1], 0  ;;  %s404_s9 = smov 0   ;;  %s406_s10 = smov 0  }
   0x2   :  { %s408_s11 = smov 0   ;;  %s410_s12 = smov 0  }
   0x3 LB: > { %s425_s13 = sadd.s32 4294967295, %s385_s12   ;;  %s266_s14 = sadd.s32 4294967294, %s385_s12   ;;  %s385_s12 = sphi %s410_s12, %s499_s12   ;;  %s381_s11 = sphi %s408_s11, %s498_s11   ;;  %s377_s10 = sphi %s406_s10, %s497_s10   ;;  %s373_s9 = sphi %s404_s9, %s496_s9  }
   0x4   : > { %s429_s15 = sadd.s32 1, %s385_s12   ;;  %s74_s16 = sadd.s32 1, %s381_s11 }
   0x5   : > { %s71_s17 = ssub.s32 %s385_s12, %s429_s15  ;;  %p84_p0 = scmp.ne.s32.totalorder %s381_s11, %s377_s10 }
   0x6   : > { %p72_p1 = scmp.eq.s32.totalorder %s71_s17, 0  ;;  %p85_p2 = scmp.eq.s32.totalorder %s425_s13, 3 }
   0x7   : > { %p90_p3 = scmp.ne.s32.totalorder %s377_s10, %s373_s9  ;;  %p91_p4 = scmp.eq.s32.totalorder %s266_s14, 3 }
   0x8   : > { %s440_s18 = scalar_select %p72_p1, %s381_s11, %s74_s16  }
   0x9   : > { %p442_p5 = por %p85_p2, %p84_p0  ;;  %p446_p6 = por %p91_p4, %p90_p3 }
   0xa   : > { %p269_p7 = scmp.ge.s32.totalorder %s385_s12, 1  ;;  %p126_p8 = scmp.lt.s32.totalorder %s385_s12, 5 }
   0xc   : > { %p127_p9 = pnand %p269_p7, %p126_p8 }
   0xd   : > { %s149_s21 = sand.u32 (!%p127_p9), 1, %s377_s10   ;;  %s271_s22 = sshll.u32 (!%p127_p9), %s425_s13, 1 }
   0xe   : > { %130 = sbr.rel (%p127_p9) target bundleno = 35 (0x23), region = 28  ;;  %s270_s23 = sshll.u32 (!%p127_p9), %s149_s21, 2 }
   0xf   : > { %p153_p10 = scmp.lt.s32.totalorder (!%p127_p9), %s271_s22, 7  ;;  %p159_p11 = scmp.lt.s32.totalorder (!%p127_p9), %s271_s22, 63 }
  0x10   : > { %s151_s4 = scalar_lea.vmem (!%p127_p9), [#allocation2], %s270_s23  ;;  %s279_s6 = sshll.u32 (!%p127_p9), %s425_s13, 2 }
  0x11   : > { %s192_s5 = sshll.u32 (!%p127_p9), %s151_s4, 4  ;;  %s191_s14 = scalar_lea.hbm (!%p127_p9), %s493_s2, %s279_s6  ;;  %s193_s5 = int_to_ptr.vmem [resolvable:$true] %s192_s5 }
  0x12   : > { %s194_s16 = sshll.u32 (!%p127_p9), %s191_s14, 4  ;;  %s180_s17 = scalar_lea.sflag (!%p127_p9), [#allocation3], %s149_s21  ;;  %s195_s16 = int_to_ptr.hbm [resolvable:$true] %s194_s16 }
  0x13   : > { %s154_s24 = scalar_select %p153_p10, %s271_s22, 7  ;;  %vm176_vm0 = vcmask 254976  }
  0x14   : > { %s501_s22 = smov (!%p159_p11, %s271_s22), 63 }
  0x15   : > { %s272_s25 = sshll.u32 %s154_s24, 1  ;;  %s161_s3 = scalar_lea.vmem %s492_s1, %s501_s22 }
  0x16   : > { %s156_s28 = scalar_lea.vmem %s491_s0, %s272_s25  ;;  %v321_v1 = vld [vmem:[%s161_s3] ss:$0 sm:$0xff]  ;;  %v322_v4 = vld [vmem:[%s161_s3 + $0x1] ss:$0 sm:$0xff]  ;;  %s337_s22 = sshra.s32 %s195_s16, 4  ;;  %s338_s22 = int_to_ptr.hbm [resolvable:$true] %s337_s22 }
  0x17   : > { %v164_v0 = vld [vmem:[%s156_s28] sm:$0x3]  ;;  %v165_v2 = vld [vmem:[%s156_s28 + $0x2] sm:$0x3]  ;;  %s339_s23 = scalar_lea.hbm %s338_s22, 4  ;;  %s343_s25 = scalar_lea.hbm %s493_s2, 16 }
  0x18   : > { %v174_v3 = vadd.f32 %v321_v1, %v164_v0  ;;  %v175_v5 = vadd.f32 %v322_v4, %v165_v2  ;;  %p340_p12 = scmp.ne.s32.totalorder %s338_s22, %s339_s23  ;;  %p344_p1 = scmp.lt.s32.totalorder %s338_s22, %s493_s2 }
  0x19   : > { %p345_p2 = scmp.lt.s32.totalorder %s343_s25, %s339_s23 }
  0x1a   : > { %177 = vst.msk [vmem:[%s151_s4] sm:$0x3] %vm176_vm0, %v174_v3  ;;  %p341_p13 = pnand %p340_p12, %p442_p5 }
  0x1b   : > { %178 = vst.msk [vmem:[%s151_s4 + $0x2] sm:$0x3] %vm176_vm0, %v175_v5  ;;  %p346_p3 = por %p345_p2, %p344_p1 }
  0x1c   : > { %p342_p0 = pneg %p341_p13 }
  0x1e   : > { %p347_p4 = pnand %p346_p3, %p342_p0 }
  0x20   : > { %350 = shalt.err (!%p347_p4)
}
  0x21   : > { %s387_s21 = smov 32   ;;  %s388_s28 = smov 2  }
  0x22   : > { %280 = dma.vmem_to_hbm [thread:$0]  (%p442_p5), %s193_s5, 64, %s195_s16, %s180_s17, %s387_s21, %s387_s21, %s388_s28  }
  0x23 PF: > { %p286_p7 = scmp.ge.s32.totalorder %s385_s12, 2  ;;  %s209_s29 = sand.u32 1, %s373_s9  }
  0x24   : > { %s210_s30 = scalar_lea.sflag [#allocation3], %s209_s29 }
  0x25   : > { %p283_p8 = pnand %p286_p7, %p446_p6 }
  0x27   : > { %p284_p9 = pneg %p283_p8 }
  0x29   : > { %368 = dma.done.wait (%p284_p9), %s210_s30, 64  }
  0x2a   : > { %370 = vsyncadd (%p284_p9), %s210_s30, 4294967232  ;;  %p12_p10 = scmp.ge.s32.totalorder %s429_s15, 6   ;;  %s496_s9 = smov %s377_s10 }
  0x2b   : > { %s497_s10 = smov %s381_s11  ;;  %s498_s11 = smov %s440_s18 }
  0x2c   : > { %s499_s12 = smov %s429_s15  ;;  %14 = sbr.rel (!%p12_p10) target bundleno = 3 (0x3), region = 66 }
  0x31   :  { %216 = vsyncpa [#allocation3], 1 }
  0x32   :  { %218 = vsyncpa [#allocation3 + $0x1], 1 }

</bundles_post_ra>
